<compile_context>
chip_gen: v6e
topology: v6e:2x2x1
jax: 0.10.0
libtpu: 0.0.40
codegen_flags: <defaults>
</compile_context>

<pallas_src>
import functools
import math

import jax
import jax.numpy as jnp
from jax.experimental import pallas as pl
from jax.experimental.pallas import tpu as pltpu


def gin_kernel(adj_ref, x_ref, xr_ref, s_ref, w1_ref, b1_ref, w2_ref, b2_ref,
               out_ref, *, reassociate):
    # Block shapes (leading batch-block dim of 1):
    #   adj_ref : (1, row_tile, N)      bf16   rows of this graph's adjacency
    #   x_ref   : (1, N, F)             bf16   full node features of this graph
    #   xr_ref  : (1, row_tile, F)      bf16   the row-tile slice of x
    #   s_ref   : (1, row_tile, 1)      f32    (eps - 1) * diag(adj) for rows
    #   w1_ref  : (F, H) bf16, b1_ref : (1, H) f32
    #   w2_ref  : (H, Cpad) bf16, b2_ref: (1, Cpad) f32 (padded lanes = -1e30)
    #   out_ref : (1, row_tile, Cpad)   f32
    adj = adj_ref[0]
    x = x_ref[0]
    xr = xr_ref[0]
    s = s_ref[0]
    w1 = w1_ref[...]
    b1 = b1_ref[...]

    if reassociate:
        # nfeat > nhid: adj_mod @ (x @ W1)  ==  adj@(x@W1) + s ⊙ (x_rows@W1)
        z = jnp.dot(x, w1, preferred_element_type=jnp.float32)        # (N, H)
        zr = jnp.dot(xr, w1, preferred_element_type=jnp.float32)      # (rt, H)
        h = (jnp.dot(adj, z.astype(jnp.bfloat16),
                     preferred_element_type=jnp.float32)
             + s * zr + b1)
    else:
        # (adj_mod @ x) @ W1  ==  (adj@x + s ⊙ x_rows) @ W1
        agg = (jnp.dot(adj, x, preferred_element_type=jnp.float32)
               + s * xr.astype(jnp.float32))                          # (rt, F)
        h = jnp.dot(agg.astype(jnp.bfloat16), w1,
                    preferred_element_type=jnp.float32) + b1

    h = jnp.maximum(h, 0.0)

    # TODO(synk): training-mode dropout (PRNG mask + 1/(1-p) scaling) not
    # implemented; F.dropout with training=False is an identity.

    logits = (jnp.dot(h.astype(jnp.bfloat16), w2_ref[...],
                      preferred_element_type=jnp.float32) + b2_ref[...])

    # Numerically stable log-softmax over the (lane-padded) class axis.
    # Padded lanes hold ~-1e30 so they never win the max and exp() to 0.
    m = jnp.max(logits, axis=-1, keepdims=True)
    shifted = logits - m
    lse = jnp.log(jnp.sum(jnp.exp(shifted), axis=-1, keepdims=True))
    out_ref[0] = shifted - lse


def graphsn_gin_forward(x, adj, eps, w1, b1, w2, b2, *, row_tile=None):
    """x: [B, N, F] (or [N, F]), adj: [B, N, N] (or [N, N]). Returns log-probs."""
    squeeze = False
    if x.ndim == 2:
        x, adj, squeeze = x[None], adj[None], True

    B, N, F = x.shape
    H = w1.shape[1]
    C = w2.shape[1]
    C_pad = max(128, ((C + 127) // 128) * 128)   # lane-dense output width

    # Row tiling keeps the per-step adj block small (VMEM-safe on v7x).
    if row_tile is None:
        row_tile = N if N <= 256 else 256
    if N % row_tile != 0:
        row_tile = N
    n_row_tiles = N // row_tile

    # Fold the diagonal rescale:  adj_mod @ x = adj @ x + (eps-1)*diag(adj) ⊙ x
    d = jnp.diagonal(adj, axis1=-2, axis2=-1)                      # [B, N]
    s = ((eps[0] - 1.0) * d)[..., None].astype(jnp.float32)        # [B, N, 1]

    # bf16 operands for the MXU (f32 accumulation inside the kernel).
    adj_bf = adj.astype(jnp.bfloat16)
    x_bf = x.astype(jnp.bfloat16)
    w1_bf = w1.astype(jnp.bfloat16)
    w2_pad = (jnp.zeros((H, C_pad), jnp.float32)
              .at[:, :C].set(w2).astype(jnp.bfloat16))
    b1_f = b1.reshape(1, H).astype(jnp.float32)
    b2_pad = (jnp.full((1, C_pad), -1e30, jnp.float32)
              .at[:, :C].set(b2.reshape(1, C)))

    reassociate = F > H
    kernel = functools.partial(gin_kernel, reassociate=reassociate)

    flops = int(B * (2 * N * N * F + 2 * N * F * H + 2 * N * H * C_pad))
    transcendentals = int(B * N * (C_pad + 1))
    bytes_accessed = int(
        adj_bf.size * 2 + 2 * x_bf.size * 2 + s.size * 4
        + w1_bf.size * 2 + b1_f.size * 4 + w2_pad.size * 2 + b2_pad.size * 4
        + B * N * C_pad * 4)

    out_pad = pl.pallas_call(
        kernel,
        out_shape=jax.ShapeDtypeStruct((B, N, C_pad), jnp.float32),
        grid=(B, n_row_tiles),
        in_specs=[
            pl.BlockSpec((1, row_tile, N), lambda b, i: (b, i, 0)),   # adj rows
            pl.BlockSpec((1, N, F), lambda b, i: (b, 0, 0)),          # x (full)
            pl.BlockSpec((1, row_tile, F), lambda b, i: (b, i, 0)),   # x rows
            pl.BlockSpec((1, row_tile, 1), lambda b, i: (b, i, 0)),   # s rows
            pl.BlockSpec((F, H), lambda b, i: (0, 0)),                # W1
            pl.BlockSpec((1, H), lambda b, i: (0, 0)),                # b1
            pl.BlockSpec((H, C_pad), lambda b, i: (0, 0)),            # W2 (pad)
            pl.BlockSpec((1, C_pad), lambda b, i: (0, 0)),            # b2 (pad)
        ],
        out_specs=pl.BlockSpec((1, row_tile, C_pad), lambda b, i: (b, i, 0)),
        compiler_params=pltpu.CompilerParams(
            dimension_semantics=("parallel", "parallel")),
        cost_estimate=pl.CostEstimate(
            flops=flops,
            transcendentals=transcendentals,
            bytes_accessed=bytes_accessed),
    )(adj_bf, x_bf, x_bf, s, w1_bf, b1_f, w2_pad, b2_pad)

    out = out_pad[..., :C]
    return out[0] if squeeze else out


def init_params(key, nfeat, nhid, nclass):
    k1, k2, k3, k4 = jax.random.split(key, 4)
    # PyTorch Linear default init: U(-1/sqrt(fan_in), 1/sqrt(fan_in))
    bound1 = 1.0 / math.sqrt(nfeat)
    w1 = jax.random.uniform(k1, (nfeat, nhid), jnp.float32, -bound1, bound1)
    b1 = jax.random.uniform(k2, (1, nhid), jnp.float32, -bound1, bound1)
    bound2 = 1.0 / math.sqrt(nhid)
    w2 = jax.random.uniform(k3, (nhid, nclass), jnp.float32, -bound2, bound2)
    b2 = jax.random.uniform(k4, (1, nclass), jnp.float32, -bound2, bound2)
    # eps reset_parameters: constant 0.6 / sqrt(1)
    eps = jnp.full((1,), 0.6 / math.sqrt(1.0), jnp.float32)
    return eps, w1, b1, w2, b2


def reference_forward(x, adj, eps, w1, b1, w2, b2):
    """Pure-JAX f32 reference matching the PyTorch module (batched)."""
    n = adj.shape[-1]
    eye = jnp.eye(n, dtype=bool)
    adj_mod = jnp.where(eye, eps[0] * adj, adj)
    h = jnp.matmul(adj_mod, x)
    h = jnp.maximum(jnp.matmul(h, w1) + b1, 0.0)
    logits = jnp.matmul(h, w2) + b2
    return jax.nn.log_softmax(logits, axis=-1)


if __name__ == "__main__":
    B, N, NFEAT, NHID, NCLASS = 4, 16, 32, 32, 8
    key = jax.random.PRNGKey(0)
    kx, ka, kp = jax.random.split(key, 3)

    x = jax.random.normal(kx, (B, N, NFEAT), jnp.float32)
    # symmetric-ish dense adjacencies with self-loops on the diagonal
    a = jax.random.uniform(ka, (B, N, N), jnp.float32)
    adj = 0.5 * (a + jnp.swapaxes(a, -1, -2)) + jnp.eye(N, dtype=jnp.float32)

    eps, w1, b1, w2, b2 = init_params(kp, NFEAT, NHID, NCLASS)

    out = graphsn_gin_forward(x, adj, eps, w1, b1, w2, b2)
    out = jax.block_until_ready(out)

    assert out.shape == (B, N, NCLASS)
    # rows of a log-softmax exponentiate-sum to ~1
    assert bool(jnp.all(jnp.abs(jnp.sum(jnp.exp(out), axis=-1) - 1.0) < 1e-3))
    # agreement with the f32 reference (loose tolerance for bf16 MXU operands)
    ref = reference_forward(x, adj, eps, w1, b1, w2, b2)
    max_err = float(jnp.max(jnp.abs(out - ref)))
    assert max_err < 0.2, f"max |pallas - ref| = {max_err}"
    print("KERNEL_OK")
</pallas_src>

<mosaic_0001>
module attributes {stable_mosaic.version = 11 : i64} {
  func.func @gin_kernel(%arg0: i32, %arg1: i32, %arg2: memref<1x16x16xbf16, #tpu.memory_space<vmem>>, %arg3: memref<1x16x32xbf16, #tpu.memory_space<vmem>>, %arg4: memref<1x16x32xbf16, #tpu.memory_space<vmem>>, %arg5: memref<1x16x1xf32, #tpu.memory_space<vmem>>, %arg6: memref<32x32xbf16, #tpu.memory_space<vmem>>, %arg7: memref<1x32xf32, #tpu.memory_space<vmem>>, %arg8: memref<32x128xbf16, #tpu.memory_space<vmem>>, %arg9: memref<1x128xf32, #tpu.memory_space<vmem>>, %arg10: memref<1x16x128xf32, #tpu.memory_space<vmem>>) attributes {dimension_semantics = [#tpu.dimension_semantics<parallel>, #tpu.dimension_semantics<parallel>], iteration_bounds = array<i64: 4, 1>, scalar_prefetch = 0 : i64, scratch_operands = 0 : i64, tpu.core_type = #tpu.core_type<tc>, window_params = [{transform_indices = @transform_0, window_bounds = array<i64: 1, 16, 16>}, {transform_indices = @transform_1, window_bounds = array<i64: 1, 16, 32>}, {transform_indices = @transform_2, window_bounds = array<i64: 1, 16, 32>}, {transform_indices = @transform_3, window_bounds = array<i64: 1, 16, 1>}, {pipeline_mode = #tpu.pipeline_mode<synchronous>, transform_indices = @transform_4, window_bounds = array<i64: 32, 32>}, {pipeline_mode = #tpu.pipeline_mode<synchronous>, transform_indices = @transform_5, window_bounds = array<i64: 1, 32>}, {pipeline_mode = #tpu.pipeline_mode<synchronous>, transform_indices = @transform_6, window_bounds = array<i64: 32, 128>}, {pipeline_mode = #tpu.pipeline_mode<synchronous>, transform_indices = @transform_7, window_bounds = array<i64: 1, 128>}, {transform_indices = @transform_8, window_bounds = array<i64: 1, 16, 128>}]} {
    %c0 = arith.constant 0 : index
    %c0_0 = arith.constant 0 : index
    %c0_1 = arith.constant 0 : index
    %0 = vector.load %arg2[%c0, %c0_0, %c0_1] : memref<1x16x16xbf16, #tpu.memory_space<vmem>>, vector<1x16x16xbf16>
    %1 = vector.shape_cast %0 : vector<1x16x16xbf16> to vector<16x16xbf16>
    %c0_2 = arith.constant 0 : index
    %c0_3 = arith.constant 0 : index
    %c0_4 = arith.constant 0 : index
    %2 = vector.load %arg3[%c0_2, %c0_3, %c0_4] : memref<1x16x32xbf16, #tpu.memory_space<vmem>>, vector<1x16x32xbf16>
    %3 = vector.shape_cast %2 : vector<1x16x32xbf16> to vector<16x32xbf16>
    %c0_5 = arith.constant 0 : index
    %c0_6 = arith.constant 0 : index
    %c0_7 = arith.constant 0 : index
    %4 = vector.load %arg4[%c0_5, %c0_6, %c0_7] : memref<1x16x32xbf16, #tpu.memory_space<vmem>>, vector<1x16x32xbf16>
    %5 = vector.shape_cast %4 : vector<1x16x32xbf16> to vector<16x32xbf16>
    %c0_8 = arith.constant 0 : index
    %c0_9 = arith.constant 0 : index
    %c0_10 = arith.constant 0 : index
    %6 = vector.load %arg5[%c0_8, %c0_9, %c0_10] : memref<1x16x1xf32, #tpu.memory_space<vmem>>, vector<1x16x1xf32>
    %7 = vector.shape_cast %6 : vector<1x16x1xf32> to vector<16x1xf32>
    %c0_11 = arith.constant 0 : index
    %c0_12 = arith.constant 0 : index
    %8 = vector.load %arg6[%c0_11, %c0_12] : memref<32x32xbf16, #tpu.memory_space<vmem>>, vector<32x32xbf16>
    %c0_13 = arith.constant 0 : index
    %c0_14 = arith.constant 0 : index
    %9 = vector.load %arg7[%c0_13, %c0_14] : memref<1x32xf32, #tpu.memory_space<vmem>>, vector<1x32xf32>
    %cst = arith.constant dense<0.000000e+00> : vector<16x32xf32>
    %10 = tpu.matmul %1, %3, %cst {dimension_numbers = #tpu.dot_dimension_numbers<[1], [0], [0], [1], [0, 0, 1, 1], [], []>} : vector<16x16xbf16>, vector<16x32xbf16>, vector<16x32xf32> -> vector<16x32xf32>
    %11 = arith.extf %5 : vector<16x32xbf16> to vector<16x32xf32>
    %12 = vector.broadcast %7 : vector<16x1xf32> to vector<16x32xf32>
    %13 = arith.mulf %12, %11 : vector<16x32xf32>
    %14 = arith.addf %10, %13 : vector<16x32xf32>
    %15 = arith.truncf %14 : vector<16x32xf32> to vector<16x32xbf16>
    %cst_15 = arith.constant dense<0.000000e+00> : vector<16x32xf32>
    %16 = tpu.matmul %15, %8, %cst_15 {dimension_numbers = #tpu.dot_dimension_numbers<[1], [0], [0], [1], [0, 0, 1, 1], [], []>} : vector<16x32xbf16>, vector<32x32xbf16>, vector<16x32xf32> -> vector<16x32xf32>
    %17 = vector.broadcast %9 : vector<1x32xf32> to vector<16x32xf32>
    %18 = arith.addf %16, %17 : vector<16x32xf32>
    %cst_16 = arith.constant 0.000000e+00 : f32
    %19 = vector.broadcast %cst_16 : f32 to vector<16x32xf32>
    %20 = arith.maximumf %18, %19 : vector<16x32xf32>
    %21 = arith.truncf %20 : vector<16x32xf32> to vector<16x32xbf16>
    %c0_17 = arith.constant 0 : index
    %c0_18 = arith.constant 0 : index
    %22 = vector.load %arg8[%c0_17, %c0_18] : memref<32x128xbf16, #tpu.memory_space<vmem>>, vector<32x128xbf16>
    %cst_19 = arith.constant dense<0.000000e+00> : vector<16x128xf32>
    %23 = tpu.matmul %21, %22, %cst_19 {dimension_numbers = #tpu.dot_dimension_numbers<[1], [0], [0], [1], [0, 0, 1, 1], [], []>} : vector<16x32xbf16>, vector<32x128xbf16>, vector<16x128xf32> -> vector<16x128xf32>
    %c0_20 = arith.constant 0 : index
    %c0_21 = arith.constant 0 : index
    %24 = vector.load %arg9[%c0_20, %c0_21] : memref<1x128xf32, #tpu.memory_space<vmem>>, vector<1x128xf32>
    %25 = vector.broadcast %24 : vector<1x128xf32> to vector<16x128xf32>
    %26 = arith.addf %23, %25 : vector<16x128xf32>
    %cst_22 = arith.constant dense<0xFF800000> : vector<16xf32>
    %27 = vector.multi_reduction <maximumf>, %26, %cst_22 [1] : vector<16x128xf32> to vector<16xf32>
    %28 = vector.shape_cast %27 : vector<16xf32> to vector<16x1xf32>
    %29 = vector.broadcast %28 : vector<16x1xf32> to vector<16x128xf32>
    %30 = arith.subf %26, %29 : vector<16x128xf32>
    %31 = math.exp %30 : vector<16x128xf32>
    %cst_23 = arith.constant dense<0.000000e+00> : vector<16xf32>
    %32 = vector.multi_reduction <add>, %31, %cst_23 [1] : vector<16x128xf32> to vector<16xf32>
    %33 = vector.shape_cast %32 : vector<16xf32> to vector<16x1xf32>
    %34 = math.log %33 : vector<16x1xf32>
    %35 = vector.broadcast %34 : vector<16x1xf32> to vector<16x128xf32>
    %36 = arith.subf %30, %35 : vector<16x128xf32>
    %c0_24 = arith.constant 0 : index
    %c0_25 = arith.constant 0 : index
    %c0_26 = arith.constant 0 : index
    %37 = vector.load %arg10[%c0_24, %c0_25, %c0_26] : memref<1x16x128xf32, #tpu.memory_space<vmem>>, vector<1x16x128xf32>
    %38 = vector.shape_cast %37 : vector<1x16x128xf32> to vector<16x128xf32>
    %39 = vector.shape_cast %36 : vector<16x128xf32> to vector<1x16x128xf32>
    tpu.vector_store %arg10[%c0_24, %c0_25, %c0_26], %39 {strides = array<i32>} : memref<1x16x128xf32, #tpu.memory_space<vmem>>, vector<1x16x128xf32>,
    return
  }
  func.func @transform_0(%arg0: i32, %arg1: i32) -> (i32, i32, i32) {
    %c0_i32 = arith.constant 0 : i32
    %c0_i32_0 = arith.constant 0 : i32
    return %arg0, %arg1, %c0_i32 : i32, i32, i32
  }
  func.func @transform_1(%arg0: i32, %arg1: i32) -> (i32, i32, i32) {
    %c0_i32 = arith.constant 0 : i32
    %c0_i32_0 = arith.constant 0 : i32
    %c0_i32_1 = arith.constant 0 : i32
    return %arg0, %c0_i32, %c0_i32_0 : i32, i32, i32
  }
  func.func @transform_2(%arg0: i32, %arg1: i32) -> (i32, i32, i32) {
    %c0_i32 = arith.constant 0 : i32
    %c0_i32_0 = arith.constant 0 : i32
    return %arg0, %arg1, %c0_i32 : i32, i32, i32
  }
  func.func @transform_3(%arg0: i32, %arg1: i32) -> (i32, i32, i32) {
    %c0_i32 = arith.constant 0 : i32
    %c0_i32_0 = arith.constant 0 : i32
    return %arg0, %arg1, %c0_i32 : i32, i32, i32
  }
  func.func @transform_4(%arg0: i32, %arg1: i32) -> (i32, i32) {
    %c0_i32 = arith.constant 0 : i32
    %c0_i32_0 = arith.constant 0 : i32
    %c0_i32_1 = arith.constant 0 : i32
    return %c0_i32, %c0_i32_0 : i32, i32
  }
  func.func @transform_5(%arg0: i32, %arg1: i32) -> (i32, i32) {
    %c0_i32 = arith.constant 0 : i32
    %c0_i32_0 = arith.constant 0 : i32
    %c0_i32_1 = arith.constant 0 : i32
    return %c0_i32, %c0_i32_0 : i32, i32
  }
  func.func @transform_6(%arg0: i32, %arg1: i32) -> (i32, i32) {
    %c0_i32 = arith.constant 0 : i32
    %c0_i32_0 = arith.constant 0 : i32
    %c0_i32_1 = arith.constant 0 : i32
    return %c0_i32, %c0_i32_0 : i32, i32
  }
  func.func @transform_7(%arg0: i32, %arg1: i32) -> (i32, i32) {
    %c0_i32 = arith.constant 0 : i32
    %c0_i32_0 = arith.constant 0 : i32
    %c0_i32_1 = arith.constant 0 : i32
    return %c0_i32, %c0_i32_0 : i32, i32
  }
  func.func @transform_8(%arg0: i32, %arg1: i32) -> (i32, i32, i32) {
    %c0_i32 = arith.constant 0 : i32
    %c0_i32_0 = arith.constant 0 : i32
    return %arg0, %arg1, %c0_i32 : i32, i32, i32
  }
}

</mosaic_0001>

<bundles_post_ra>
// kernel: tpu_custom_call.1
= control target key start
LH: loop header
LB: loop body
LE: loop exit
PB: predicated region body
PF: predicated region fallthrough
CT: control target
= control target key end

     0   :  { %s1498_s0 = inlined_call_operand.vmem [shape: bf16[4,16,16], index: 0, kind: input, shape index: {}]   ;;  %s1499_s1 = inlined_call_operand.vmem [shape: bf16[4,16,32], index: 1, kind: input, shape index: {}]   ;;  %s1500_s2 = inlined_call_operand.hbm [shape: bf16[4,16,32], index: 2, kind: input, shape index: {}]   ;;  %s1501_s3 = inlined_call_operand.vmem [shape: f32[4,16,1], index: 3, kind: input, shape index: {}]   ;;  %s1502_s4 = inlined_call_operand.hbm [shape: bf16[32,32], index: 4, kind: input, shape index: {}]   ;;  %s1503_s5 = inlined_call_operand.vmem [shape: f32[1,32], index: 5, kind: input, shape index: {}]   ;;  %s1504_s6 = inlined_call_operand.hbm [shape: bf16[32,128], index: 6, kind: input, shape index: {}]   ;;  %s1505_s7 = inlined_call_operand.vmem [shape: f32[1,128], index: 7, kind: input, shape index: {}]   ;;  %s1506_s8 = inlined_call_operand.hbm [shape: f32[4,16,128], index: 8, kind: output, shape index: {}]  }
   0x1   :  { %1511 = sst [smem:[#allocation14_spill]] %s1502_s4 }
   0x2   :  { %1512 = sst [smem:[#allocation15_spill]] %s1504_s6 }
   0x3   :  { %13 = vsyncpa [#allocation3], 0 }
   0x4   :  { %15 = vsyncpa [#allocation3 + $0x1], 0 }
   0x5   :  { %16 = vsyncpa [#allocation6], 0 }
   0x6   :  { %17 = vsyncpa [#allocation4], 0 }
   0x7   :  { %19 = vsyncpa [#allocation4 + $0x1], 0  ;;  %s1277_s27 = smov 0   ;;  %s1279_s28 = smov 0  }
   0x8   :  { %s1281_s29 = smov 0   ;;  %s1283_s30 = smov 0  }
   0x9   :  { %s1285_s9 = smov 0   ;;  %s1287_s10 = smov 0  }
   0xa LB: > { %1513 = sst [smem:[#allocation12_spill]] %s1215_s9  ;;  %s875_s11 = sadd.s32 4294967295, %s1219_s10   ;;  %s1219_s10 = sphi %s1287_s10, %s25_s10   ;;  %s1215_s9 = sphi %s1285_s9, %s1529_s9   ;;  %s1211_s30 = sphi %s1283_s30, %s1528_s30   ;;  %s1207_s29 = sphi %s1281_s29, %s1532_s29   ;;  %s1203_s28 = sphi %s1279_s28, %s1531_s28   ;;  %s1199_s27 = sphi %s1277_s27, %s1530_s27  }
   0xb   : > { %s876_s12 = sadd.s32 4294967294, %s1219_s10   ;;  %p113_p0 = scmp.ne.s32.totalorder %s1203_s28, %s1199_s27 }
   0xc   : > { %p1311_p1 = scmp.eq.s32.totalorder %s875_s11, 0  ;;  %p1315_p2 = scmp.eq.s32.totalorder %s875_s11, 3 }
   0xd   : > { %p257_p3 = scmp.eq.s32.totalorder %s876_s12, 3  ;;  %p877_p5 = scmp.ge.s32.totalorder %s1219_s10, 1 }
   0xe   : > { %p1321_p4 = por %p1311_p1, %p113_p0  ;;  %p264_p7 = scmp.lt.s32.totalorder %s1219_s10, 5 }
   0xf   : > { %p1326_p6 = por %p257_p3, %p113_p0  ;;  %s1221_s18 = smov [#allocation5]  }
  0x10   : > { %p1331_p8 = pnand %p877_p5, %p264_p7  ;;  %s276_s19 = sshll.u32 %s1221_s18, 4  ;;  %s277_s19 = int_to_ptr.vmem [resolvable:$true] %s276_s19 }
  0x11   : > { %s1517_s16 = scalar_select %p1326_p6, 1, 0 }
  0x12   : > { %p962_p9 = pneg %p1331_p8  ;;  %s1222_s21 = smov [#allocation7]  }
  0x13   : > { %s292_s22 = sshll.u32 %s1222_s21, 4  ;;  %s1066_s23 = scalar_lea.vmem %s277_s19, 256  ;;  %s293_s22 = int_to_ptr.vmem [resolvable:$true] %s292_s22 }
  0x14   : > { %p1339_p10 = pnand %p962_p9, %p1311_p1  ;;  %p1067_p12 = scmp.ne.s32.totalorder %s277_s19, %s1066_s23 }
  0x15   : > { %p1074_p3 = scmp.lt.s32.totalorder %s277_s19, %s277_s19  ;;  %p1075_p5 = scmp.lt.s32.totalorder %s1066_s23, %s1066_s23 }
  0x16   : > { %p1057_p11 = pneg %p1339_p10 }
  0x17   : > { %p1076_p7 = por %p1075_p5, %p1074_p3 }
  0x18   : > { %p1069_p13 = pnand %p1067_p12, %p1057_p11 }
  0x1a   : > { %p1070_p0 = pneg %p1069_p13 }
  0x1c   : > { %p1077_p9 = pnand %p1076_p7, %p1070_p0 }
  0x1e   : > { %1080 = shalt.err (!%p1077_p9)
}
  0x1f   : > { %s1507_s24 = smov 64   ;;  %s1508_s25 = smov 4  }
  0x20   : > { %s1520_s4 = sld [smem:[#allocation14_spill]]  ;;  %s1092_s12 = scalar_lea.vmem %s293_s22, 256 }
  0x21   : > { %p1093_p12 = scmp.ne.s32.totalorder %s293_s22, %s1092_s12  ;;  %p1100_p0 = scmp.lt.s32.totalorder %s293_s22, %s293_s22 }
  0x22   : > { %p1101_p5 = scmp.lt.s32.totalorder %s1092_s12, %s1092_s12 }
  0x23   : > { %p1095_p13 = pnand %p1093_p12, %p1057_p11 }
  0x24   : > { %p1102_p7 = por %p1101_p5, %p1100_p0 }
  0x25   : > { %p1096_p3 = pneg %p1095_p13 }
  0x26   : > { %965 = dma.hbm_to_vmem [thread:$0]  (!%p1339_p10), %s1520_s4, 256, %s277_s19, [#allocation6], %s1507_s24, %s1507_s24, %s1508_s25  }
  0x27   : > { %p1103_p9 = pnand %p1102_p7, %p1096_p3 }
  0x29   : > { %1106 = shalt.err (!%p1103_p9)
}
  0x2a   : > { %s1521_s6 = sld [smem:[#allocation15_spill]]  ;;  %s37_s19 = sadd.s32 1, %s1215_s9 }
  0x2b   : > { %s100_s20 = sadd.s32 1, %s1207_s29  ;;  %p39_p11 = scmp.ge.s32.totalorder %s37_s19, 4 }
  0x2c   : > { %p107_p12 = scmp.ne.s32.totalorder %s1207_s29, %s1203_s28  ;;  %p108_p13 = scmp.eq.s32.totalorder %s1219_s10, 0 }
  0x2d   : > { %p979_p3 = scmp.lt.s32.totalorder %s1219_s10, 4  ;;  %s1534_s19 = smov (%p39_p11, %s37_s19), 0 }
  0x2e   : > { %1522 = sst [smem:[#allocation13_spill]] %s1534_s19  ;;  %p109_p0 = por %p108_p13, %p107_p12 }
  0x2f   : > { %p1377_p5 = por %p1315_p2, %p107_p12  ;;  %s95_s26 = ssub.s32 %s1215_s9, %s1534_s19 }
  0x30   : > { %968 = dma.hbm_to_vmem [thread:$0]  (!%p1339_p10), %s1521_s6, 256, %s293_s22, [#allocation6], %s1507_s24, %s1507_s24, %s1508_s25  }
  0x31   : > { %s330_s11 = sand.u32 1, %s1207_s29   ;;  %p98_p7 = scmp.eq.s32.totalorder %s95_s26, 0 }
  0x32   : > { %s881_s22 = sshll.u32 %s330_s11, 3  ;;  %s911_s12 = sshll.u32 %s1215_s9, 7 }
  0x33   : > { %s1386_s18 = scalar_select %p98_p7, %s1207_s29, %s100_s20  }
  0x34   : > { %s342_s25 = scalar_lea.hbm %s1500_s2, %s911_s12  ;;  %s334_s4 = scalar_lea.vmem [#allocation2], %s881_s22 }
  0x35   : > { %s343_s6 = sshll.u32 %s334_s4, 4  ;;  %p1393_p10 = pnand %p979_p3, %p109_p0  ;;  %s344_s6 = int_to_ptr.vmem [resolvable:$true] %s343_s6 }
  0x36   : > { %s331_s19 = scalar_lea.sflag [#allocation3], %s330_s11  ;;  %s1120_s26 = scalar_lea.vmem %s344_s6, 128 }
  0x37   : > { %p1109_p2 = pneg %p1393_p10  ;;  %p1121_p9 = scmp.ne.s32.totalorder %s344_s6, %s1120_s26 }
  0x38   : > { %s1225_s20 = smov [#allocation2]  }
  0x39   : > { %p1123_p11 = pnand %p1121_p9, %p1109_p2  ;;  %s1125_s9 = sshll.u32 %s1225_s20, 4  ;;  %s1126_s9 = int_to_ptr.vmem [resolvable:$false] %s1125_s9 }
  0x3a   : > { %s1127_s24 = scalar_lea.vmem %s1126_s9, 256  ;;  %p1128_p13 = scmp.lt.s32.totalorder %s344_s6, %s1126_s9 }
  0x3b   : > { %p1124_p12 = pneg %p1123_p11  ;;  %p1129_p7 = scmp.lt.s32.totalorder %s1127_s24, %s1120_s26 }
  0x3d   : > { %p1130_p6 = por %p1129_p7, %p1128_p13 }
  0x3f   : > { %p1131_p3 = pnand %p1130_p6, %p1124_p12 }
  0x41   : > { %1134 = shalt.err (!%p1131_p3)
}
  0x42   : > { %s1525_s4 = smov 4   ;;  %s1526_s22 = smov 64  }
  0x43   : > { %972 = dma.hbm_to_vmem [thread:$0]  (!%p1393_p10), %s342_s25, 128, %s344_s6, %s331_s19, %s1526_s22, %s1526_s22, %s1525_s4  }
  0x44   : > { %368 = sbr.rel (%p1331_p8) target bundleno = 1015 (0x3f7), region = 52  ;;  %s1407_s11 = sand.u32 (!%p1331_p8), 1, %s1203_s28  }
  0x45   : > { %s885_s9 = sshll.u32 (!%p1331_p8), %s1407_s11, 3  ;;  %s371_s12 = scalar_lea.sflag (!%p1331_p8), [#allocation3], %s1407_s11 }
  0x46   : > { %s1411_s21 = scalar_lea.vmem (!%p1331_p8), [#allocation2], %s885_s9 }
  0x49   : > { %1186 = dma.done.wait (%p1321_p4), %s371_s12, 128  }
  0x4a   : > { %1188 = vsyncadd (%p1321_p4), %s371_s12, 4294967168 }
  0x4b   : > { %1190 = dma.done.wait (%p1311_p1), [#allocation6], 512  }
  0x4c   : > { %1192 = vsyncadd (%p1311_p1), [#allocation6], 4294966784  ;;  %p439_p6 = scmp.lt.s32.totalorder %s1211_s30, 3  ;;  %v1226_v0 = vmov 0.0   ;;  %vm1227_vm0 = vmmov 0   ;;  %v1228_v1 = vmov 0  }
  0x4d   : > { %928 = vmatprep.subr.bf16.mxu0 %v1226_v0  ;;  %930 = vmatprep.mubr.msk.bf16.mxu0 %vm1227_vm0, %v1226_v0  ;;  %vm504_vm1 = vcmask 130048   ;;  %v1043_v6 = vld [vmem:[#allocation5 + $0x8] sm:$0xff]   ;;  %v1044_v7 = vld [vmem:[#allocation5] sm:$0xff]   ;;  %v917_v9 = vld [vmem:[%s1411_s21] sm:$0xff]   ;;  %vm568_vm2 = vcmask 261120   ;;  %s915_s19 = sshll.u32 %s1211_s30, 8 }
  0x4e   : > { %s440_s6 = scalar_select %p439_p6, %s1211_s30, 3  ;;  %1040 = vset.pattern.permute.xlu0 %v1228_v1  ;;  %934 = vmatprep.subr.bf16.mxu1 %v1226_v0  ;;  %v918_v10 = vunpack.c.l.bf16 %v917_v9  ;;  %v919_v11 = vunpack.c.h.bf16 %v917_v9  ;;  %v1045_v22 = vld [vmem:[#allocation7 + $0x8] sm:$0xff]   ;;  %v1046_v23 = vld [vmem:[#allocation7] sm:$0xff]  }
  0x4f   : > { %938 = vmatprep.mubr.msk.bf16.mxu1 %vm1227_vm0, %v1226_v0  ;;  %935 = vmatpush3.bf16.msra.mxu1 %v1043_v6  ;;  %v898_v24 = vld [vmem:[%s1503_s5] ss:$0 sm:$0xff]  ;;  %s1451_s26 = scalar_lea.hbm %s1506_s8, %s915_s19  ;;  %s1229_s30 = smov [#allocation8]  }
  0x50   : > { %s912_s15 = sshll.u32 %s440_s6, 3  ;;  %s914_s17 = sshll.u32 %s440_s6, 4  ;;  %936 = vmatprep.subr.bf16.mxu1 %v1226_v0  ;;  %v902_v34 = vld [vmem:[%s1505_s7] ss:$0 sm:$0xff] }
  0x51   : > { %s452_s13 = scalar_lea.vmem %s1499_s1, %s912_s15  ;;  %s446_s20 = scalar_lea.vmem %s1498_s0, %s912_s15 }
  0x52   : > { %s462_s22 = scalar_lea.vmem %s1501_s3, %s914_s17  ;;  %v1041_v2 = vld [vmem:[%s452_s13] sm:$0xff]   ;;  %s888_s15 = sshll.u32 %s1407_s11, 4 }
  0x53   : > { %v1042_v3 = vld [vmem:[%s446_s20] sm:$0xff]   ;;  %v473_v5 = vld [vmem:[%s462_s22 + $0x8] sm:$0xff]  ;;  %929 = vmatpush3.bf16.msra.mxu0 %v1041_v2  ;;  %937 = vmatpush3.bf16.msra.mxu1 %v1044_v7  ;;  %s437_s17 = scalar_lea.vmem [#allocation8], %s888_s15  ;;  %s706_s20 = scalar_lea.sflag [#allocation4], %s1407_s11 }
  0x54   : > { %v472_v4 = vld [vmem:[%s462_s22] sm:$0xff]  ;;  %942 = vmatprep.subr.bf16.mxu0 %v1226_v0  ;;  %s721_s25 = sshll.u32 %s437_s17, 4  ;;  %s1139_s4 = sshll.u32 %s1229_s30, 4  ;;  %s1446_s25 = int_to_ptr.vmem [resolvable:$true] %s721_s25  ;;  %s1140_s4 = int_to_ptr.vmem [resolvable:$false] %s1139_s4 }
  0x55   : > { %483 = vperm.xlu0 %1040, %v472_v4   ;;  %s1135_s24 = scalar_lea.vmem %s1446_s25, 256  ;;  %s1141_s22 = scalar_lea.vmem %s1140_s4, 512 }
  0x56   : > { %931 = vmatmul.mubr.msk.bf16.vlgmr.msra.gmra.mxu0 %vm504_vm1, %v1042_v3  ;;  %p1136_p1 = scmp.ne.s32.totalorder %s1446_s25, %s1135_s24  ;;  %p1142_p0 = scmp.lt.s32.totalorder %s1446_s25, %s1140_s4 }
  0x57   : > { %946 = vmatprep.mubr.msk.bf16.mxu0 %vm1227_vm0, %v1226_v0  ;;  %943 = vmatpush3.bf16.msra.mxu0 %v1045_v22  ;;  %p1143_p10 = scmp.lt.s32.totalorder %s1141_s22, %s1135_s24 }
  0x58   : > { %944 = vmatprep.subr.bf16.mxu0 %v1226_v0  ;;  %p1137_p4 = pnand %p1136_p1, %p1377_p5 }
  0x59   : > { %488 = vperm.xlu0 %1040, %v473_v5   ;;  %p1144_p2 = por %p1143_p10, %p1142_p0 }
  0x5a   : > { %p1138_p8 = pneg %p1137_p4 }
  0x5b   : > { %945 = vmatpush3.bf16.msra.mxu0 %v1046_v23 }
  0x5c   : > { %p1145_p9 = pnand %p1144_p2, %p1138_p8 }
  0xd0   : > { %v484_v8 = vpop.permute.xlu0 %483 }
  0xd1   : > { %v491_v14 = vmul.f32 %v918_v10, %v484_v8 }
  0xd4   : > { %v489_v12 = vpop.permute.xlu0 %488 }
  0xd5   : > { %v492_v16 = vmul.f32 %v919_v11, %v489_v12 }
 0x116   : > { %v542_v13 = vpop.f32.mrf.mxu0 }
 0x117   : > { %v543_v18 = vadd.f32 %v542_v13, %v491_v14 }
 0x118   : > { %v932_v15 = vpop.f32.mrf.mxu0 }
 0x11a   : > { %v545_v17 = vpop.f32.mrf.mxu0 }
 0x11b   : > { %v546_v19 = vadd.f32 %v545_v17, %v492_v16 }
 0x11c   : > { %v933_v20 = vpop.f32.mrf.mxu0 }
 0x11d   : > { %v549_v21 = vpack.c.bf16 %v546_v19, %v543_v18 }
 0x11f   : > { %939 = vmatmul.mubr.msk.bf16.vlgmr.msra.gmra.mxu1 %vm568_vm2, %v549_v21 }
 0x1df   : > { %v606_v25 = vpop.f32.mrf.mxu1 }
 0x1e0   : > { %v607_v27 = vadd.f32 %v898_v24, %v606_v25 }
 0x1e1   : > { %v940_v26 = vpop.f32.mrf.mxu1 }
 0x1e2   : > { %v613_v31 = vmax.f32 %v607_v27, 0.0 }
 0x1e3   : > { %v609_v28 = vpop.f32.mrf.mxu1 }
 0x1e4   : > { %v610_v29 = vadd.f32 %v898_v24, %v609_v28 }
 0x1e5   : > { %v941_v30 = vpop.f32.mrf.mxu1 }
 0x1e6   : > { %v614_v32 = vmax.f32 %v610_v29, 0.0 }
 0x1e8   : > { %v615_v33 = vpack.c.bf16 %v614_v32, %v613_v31 }
 0x1ea   : > { %947 = vmatmul.mubr.msk.bf16.vlgmr.msra.gmra.mxu0 %vm568_vm2, %v615_v33 }
 0x2aa   : > { %v676_v35 = vpop.f32.mrf.mxu0 }
 0x2ab   : > { %v677_v36 = vadd.f32 %v902_v34, %v676_v35 }
 0x2ac   : > { %v948_v37 = vpop.f32.mrf.mxu0 }
 0x2ad   : > { %683 = vmax.xlane.f32.xlu1 %v677_v36 }
 0x2ae   : > { %v679_v38 = vpop.f32.mrf.mxu0 }
 0x2af   : > { %v680_v39 = vadd.f32 %v902_v34, %v679_v38 }
 0x2b0   : > { %v949_v40 = vpop.f32.mrf.mxu0 }
 0x2b1   : > { %685 = vmax.xlane.f32.xlu1 %v680_v39 }
 0x336   : > { %v684_v41 = vpop.xlane.xlu1 %683 }
 0x337   : > { %v687_v42 = vsub.f32 %v677_v36, %v684_v41 }
 0x339   : > { %v689_v43 = vmul.f32 1.442695, %v687_v42 }
 0x33a   : > { %v686_v44 = vpop.xlane.xlu1 %685 }
 0x33b   : > { %1047 = vpow2.f32 %v689_v43  ;;  %v688_v45 = vsub.f32 %v680_v39, %v686_v44 }
 0x33d   : > { %v691_v46 = vmul.f32 1.442695, %v688_v45 }
 0x33f   : > { %1049 = vpow2.f32 %v691_v46 }
 0x348   : > { %v1048_v47 = vpop.eup %1047 }
 0x349   : > { %693 = vadd.xlane.f32.xlu0 %v1048_v47 }
 0x34c   : > { %v1050_v48 = vpop.eup %1049 }
 0x34d   : > { %695 = vadd.xlane.f32.xlu1 %v1050_v48 }
 0x3d2   : > { %v694_v49 = vpop.xlane.xlu0 %693 }
 0x3d3   : > { %1051 = vlog2.f32 %v694_v49 }
 0x3d6   : > { %v696_v50 = vpop.xlane.xlu1 %695 }
 0x3d7   : > { %1053 = vlog2.f32 %v696_v50 }
 0x3e0   : > { %v1052_v51 = vpop.eup %1051 }
 0x3e1   : > { %v698_v52 = vmul.f32 0.6931472, %v1052_v51 }
 0x3e3   : > { %v701_v53 = vsub.f32 %v687_v42, %v698_v52 }
 0x3e4   : > { %v1054_v54 = vpop.eup %1053 }
 0x3e5   : > { %703 = vst [vmem:[%s437_s17] sm:$0xff] %v701_v53  ;;  %v700_v55 = vmul.f32 0.6931472, %v1054_v54 }
 0x3e7   : > { %v702_v56 = vsub.f32 %v688_v45, %v700_v55 }
 0x3e9   : > { %704 = vst [vmem:[%s437_s17 + $0x8] sm:$0xff] %v702_v56 }
 0x3ea   : > { %1148 = shalt.err (!%p1145_p9)
}
 0x3eb   : > { %s1149_s9 = scalar_lea.hbm %s1451_s26, 256  ;;  %s1153_s6 = scalar_lea.hbm %s1506_s8, 1024 }
 0x3ec   : > { %p1150_p11 = scmp.ne.s32.totalorder %s1451_s26, %s1149_s9  ;;  %p1154_p7 = scmp.lt.s32.totalorder %s1451_s26, %s1506_s8 }
 0x3ed   : > { %p1155_p3 = scmp.lt.s32.totalorder %s1153_s6, %s1149_s9 }
 0x3ee   : > { %p1151_p12 = pnand %p1150_p11, %p1377_p5 }
 0x3ef   : > { %p1156_p6 = por %p1155_p3, %p1154_p7 }
 0x3f0   : > { %p1152_p13 = pneg %p1151_p12 }
 0x3f2   : > { %p1157_p1 = pnand %p1156_p6, %p1152_p13 }
 0x3f4   : > { %1160 = shalt.err (!%p1157_p1)
}
 0x3f5   : > { %s1230_s19 = smov 128   ;;  %s1231_s13 = smov 8  }
 0x3f6   : > { %960 = dma.vmem_to_hbm [thread:$0]  (%p1377_p5), %s1446_s25, 256, %s1451_s26, %s706_s20, %s1230_s19, %s1230_s19, %s1231_s13  }
 0x3f7 PF: > { %p982_p4 = scmp.ge.s32.totalorder %s1219_s10, 2  ;;  %s736_s14 = sand.u32 1, %s1199_s27  }
 0x3f8   : > { %p1527_p8 = scmp.ne.s32.totalorder %s1517_s16, 0  ;;  %s737_s24 = scalar_lea.sflag [#allocation4], %s736_s14 }
 0x3fa   : > { %p974_p0 = pnand %p982_p4, %p1527_p8 }
 0x3fc   : > { %p975_p10 = pneg %p974_p0 }
 0x3fe   : > { %1194 = dma.done.wait (%p975_p10), %s737_s24, 256  }
 0x3ff   : > { %1196 = vsyncadd (%p975_p10), %s737_s24, 4294967040  ;;  %s25_s10 = sadd.s32 1, %s1219_s10   ;;  %s1528_s30 = sld [smem:[#allocation12_spill]] }
 0x400   : > { %p22_p2 = scmp.ge.s32.totalorder %s25_s10, 6   ;;  %s1529_s9 = sld [smem:[#allocation13_spill]] }
 0x401   : > { %s1530_s27 = smov %s1203_s28  ;;  %s1531_s28 = smov %s1207_s29 }
 0x402   : > { %s1532_s29 = smov %s1386_s18  ;;  %24 = sbr.rel (!%p22_p2) target bundleno = 10 (0xa), region = 114 }
 0x407   :  { %742 = vsyncpa [#allocation3], 1 }
 0x408   :  { %744 = vsyncpa [#allocation3 + $0x1], 1 }
 0x409   :  { %745 = vsyncpa [#allocation6], 1 }
 0x40a   :  { %746 = vsyncpa [#allocation4], 1 }
 0x40b   :  { %748 = vsyncpa [#allocation4 + $0x1], 1 }

</bundles_post_ra>
